<compile_context>
chip_gen: v7x
topology: tpu7x:2x2x1
jax: 0.10.0
libtpu: 0.0.40
codegen_flags: <defaults>
</compile_context>

<pallas_src>
import jax
import jax.numpy as jnp
from jax.experimental import pallas as pl
from jax.experimental.pallas import tpu as pltpu

NEG_SLOPE = 0.01
BN_EPS = 1e-5
LANE = 128


def _leaky_relu(x):
    return jnp.where(x >= 0, x, NEG_SLOPE * x)


def _batchnorm_train_fused(h, gamma, beta):
    # BatchNorm1d training mode: batch statistics over axis 0 (biased var),
    # folded into a single per-element FMA. rsqrt goes to the EUP slot.
    mean = jnp.mean(h, axis=0, keepdims=True)
    var = jnp.mean(h * h, axis=0, keepdims=True) - mean * mean
    scale = jax.lax.rsqrt(var + BN_EPS) * gamma
    shift = beta - mean * scale
    return h * scale + shift


def _generator_kernel(
    x_ref,
    w1_ref, b1_ref, g1_ref, be1_ref,
    w2_ref, b2_ref, g2_ref, be2_ref,
    w3_ref, b3_ref, g3_ref, be3_ref,
    w4_ref, b4_ref,
    out_ref,
):
    # MXU operands may be bf16 (f32 accumulation); all VPU/BN math stays f32.
    w_dtype = w1_ref.dtype

    # Block 1
    h = jnp.dot(x_ref[...], w1_ref[...], preferred_element_type=jnp.float32)
    h = h + b1_ref[...]
    h = _leaky_relu(h)
    h = _batchnorm_train_fused(h, g1_ref[...], be1_ref[...])

    # Block 2
    h = jnp.dot(h.astype(w_dtype), w2_ref[...], preferred_element_type=jnp.float32)
    h = h + b2_ref[...]
    h = _leaky_relu(h)
    h = _batchnorm_train_fused(h, g2_ref[...], be2_ref[...])

    # Block 3
    h = jnp.dot(h.astype(w_dtype), w3_ref[...], preferred_element_type=jnp.float32)
    h = h + b3_ref[...]
    h = _leaky_relu(h)
    h = _batchnorm_train_fused(h, g3_ref[...], be3_ref[...])

    # Output projection (lane-dense (B, out_p) store)
    out = jnp.dot(h.astype(w_dtype), w4_ref[...], preferred_element_type=jnp.float32)
    out_ref[...] = (out + b4_ref[...]).astype(out_ref.dtype)


def _round_up(n, m):
    return ((n + m - 1) // m) * m


def _pad2(a, rows, cols):
    return jnp.pad(a, ((0, rows - a.shape[0]), (0, cols - a.shape[1])))


def linear_generator_b(x, params, mxu_dtype=jnp.float32):
    """Run the LinearGeneratorB forward pass in a single Pallas kernel.

    x:         (B, input_dimB) float32
    params:    dict of weights (see init_params). Linear weights are (in, out).
    mxu_dtype: dtype for matmul operands (use jnp.bfloat16 on v6e/v7x for
               production sizes; accumulation is always f32).
    """
    B, in_dim = x.shape
    dim = params["w1"].shape[1]
    out_dim = params["w4"].shape[1]

    # Pad every feature axis to a lane-dense multiple of 128. Padded weight
    # columns / biases / BN params are zero, so padded features stay exactly
    # zero through LeakyReLU and BN and never contaminate real columns.
    in_p = _round_up(in_dim, LANE)
    dim_p = _round_up(dim, LANE)
    out_p = _round_up(out_dim, LANE)

    xp = _pad2(x, B, in_p).astype(mxu_dtype)
    w1 = _pad2(params["w1"], in_p, dim_p).astype(mxu_dtype)
    w2 = _pad2(params["w2"], dim_p, dim_p).astype(mxu_dtype)
    w3 = _pad2(params["w3"], dim_p, dim_p).astype(mxu_dtype)
    w4 = _pad2(params["w4"], dim_p, out_p).astype(mxu_dtype)
    b1 = _pad2(params["b1"], 1, dim_p)
    b2 = _pad2(params["b2"], 1, dim_p)
    b3 = _pad2(params["b3"], 1, dim_p)
    b4 = _pad2(params["b4"], 1, out_p)
    g1 = _pad2(params["g1"], 1, dim_p)
    g2 = _pad2(params["g2"], 1, dim_p)
    g3 = _pad2(params["g3"], 1, dim_p)
    be1 = _pad2(params["be1"], 1, dim_p)
    be2 = _pad2(params["be2"], 1, dim_p)
    be3 = _pad2(params["be3"], 1, dim_p)

    inputs = (
        xp,
        w1, b1, g1, be1,
        w2, b2, g2, be2,
        w3, b3, g3, be3,
        w4, b4,
    )

    # TODO(synk): for large production batches, tile B as a grid axis with a
    # two-pass BN (sum/sumsq reduction across batch tiles) instead of this
    # single whole-batch invocation; naive batch tiling would change BN stats.
    vmem = pltpu.MemorySpace.VMEM
    out_padded = pl.pallas_call(
        _generator_kernel,
        out_shape=jax.ShapeDtypeStruct((B, out_p), jnp.float32),
        in_specs=[pl.BlockSpec(memory_space=vmem) for _ in inputs],
        out_specs=pl.BlockSpec(memory_space=vmem),
    )(*inputs)

    return out_padded[:, :out_dim]


def init_params(key, input_dimB, output_dim, dim):
    """Deterministic PyTorch-style init. Linear weights stored as (in, out)."""
    def linear(key, fan_in, fan_out):
        kw, kb = jax.random.split(key)
        bound = 1.0 / jnp.sqrt(jnp.float32(fan_in))
        w = jax.random.uniform(kw, (fan_in, fan_out), jnp.float32, -bound, bound)
        b = jax.random.uniform(kb, (1, fan_out), jnp.float32, -bound, bound)
        return w, b

    k1, k2, k3, k4 = jax.random.split(key, 4)
    w1, b1 = linear(k1, input_dimB, dim)
    w2, b2 = linear(k2, dim, dim)
    w3, b3 = linear(k3, dim, dim)
    w4, b4 = linear(k4, dim, output_dim)

    ones = jnp.ones((1, dim), jnp.float32)
    zeros = jnp.zeros((1, dim), jnp.float32)
    return {
        "w1": w1, "b1": b1, "g1": ones, "be1": zeros,
        "w2": w2, "b2": b2, "g2": ones, "be2": zeros,
        "w3": w3, "b3": b3, "g3": ones, "be3": zeros,
        "w4": w4, "b4": b4,
    }


def _bn_ref(h, gamma, beta):
    # Two-pass formulation (independent of the kernel's single-pass variance).
    mean = jnp.mean(h, axis=0, keepdims=True)
    var = jnp.mean((h - mean) * (h - mean), axis=0, keepdims=True)
    return (h - mean) * jax.lax.rsqrt(var + BN_EPS) * gamma + beta


def _reference(x, p):
    """Pure-JAX reference of the same forward pass (unpadded, f32)."""
    h = x @ p["w1"] + p["b1"]
    h = _leaky_relu(h)
    h = _bn_ref(h, p["g1"], p["be1"])
    h = h @ p["w2"] + p["b2"]
    h = _leaky_relu(h)
    h = _bn_ref(h, p["g2"], p["be2"])
    h = h @ p["w3"] + p["b3"]
    h = _leaky_relu(h)
    h = _bn_ref(h, p["g3"], p["be3"])
    return h @ p["w4"] + p["b4"]


if __name__ == "__main__":
    input_dimB, output_dim, dim = 8, 16, 32
    batch = 8

    key = jax.random.PRNGKey(0)
    kx, kp = jax.random.split(key)
    x = jax.random.normal(kx, (batch, input_dimB), jnp.float32)
    params = init_params(kp, input_dimB, output_dim, dim)

    out = linear_generator_b(x, params)
    out = jax.block_until_ready(out)

    ref = _reference(x, params)
    assert out.shape == (batch, output_dim)
    assert jnp.allclose(out, ref, atol=1e-4, rtol=1e-4), "mismatch vs JAX reference"

    print("KERNEL_OK")
</pallas_src>

<mosaic_0001>
module attributes {stable_mosaic.version = 11 : i64} {
  func.func @_generator_kernel(%arg0: memref<8x128xf32, #tpu.memory_space<vmem>>, %arg1: memref<128x128xf32, #tpu.memory_space<vmem>>, %arg2: memref<1x128xf32, #tpu.memory_space<vmem>>, %arg3: memref<1x128xf32, #tpu.memory_space<vmem>>, %arg4: memref<1x128xf32, #tpu.memory_space<vmem>>, %arg5: memref<128x128xf32, #tpu.memory_space<vmem>>, %arg6: memref<1x128xf32, #tpu.memory_space<vmem>>, %arg7: memref<1x128xf32, #tpu.memory_space<vmem>>, %arg8: memref<1x128xf32, #tpu.memory_space<vmem>>, %arg9: memref<128x128xf32, #tpu.memory_space<vmem>>, %arg10: memref<1x128xf32, #tpu.memory_space<vmem>>, %arg11: memref<1x128xf32, #tpu.memory_space<vmem>>, %arg12: memref<1x128xf32, #tpu.memory_space<vmem>>, %arg13: memref<128x128xf32, #tpu.memory_space<vmem>>, %arg14: memref<1x128xf32, #tpu.memory_space<vmem>>, %arg15: memref<8x128xf32, #tpu.memory_space<vmem>>) attributes {dimension_semantics = [], scalar_prefetch = 0 : i64, scratch_operands = 0 : i64, tpu.core_type = #tpu.core_type<tc>} {
    %c0 = arith.constant 0 : index
    %c0_0 = arith.constant 0 : index
    %0 = vector.load %arg0[%c0, %c0_0] : memref<8x128xf32, #tpu.memory_space<vmem>>, vector<8x128xf32>
    %c0_1 = arith.constant 0 : index
    %c0_2 = arith.constant 0 : index
    %1 = vector.load %arg1[%c0_1, %c0_2] : memref<128x128xf32, #tpu.memory_space<vmem>>, vector<128x128xf32>
    %cst = arith.constant dense<0.000000e+00> : vector<8x128xf32>
    %2 = tpu.matmul %0, %1, %cst {dimension_numbers = #tpu.dot_dimension_numbers<[1], [0], [0], [1], [0, 0, 1, 1], [], []>} : vector<8x128xf32>, vector<128x128xf32>, vector<8x128xf32> -> vector<8x128xf32>
    %c0_3 = arith.constant 0 : index
    %c0_4 = arith.constant 0 : index
    %3 = vector.load %arg2[%c0_3, %c0_4] : memref<1x128xf32, #tpu.memory_space<vmem>>, vector<1x128xf32>
    %4 = vector.broadcast %3 : vector<1x128xf32> to vector<8x128xf32>
    %5 = arith.addf %2, %4 : vector<8x128xf32>
    %cst_5 = arith.constant 0.000000e+00 : f32
    %6 = vector.broadcast %cst_5 : f32 to vector<8x128xf32>
    %7 = arith.cmpf oge, %5, %6 : vector<8x128xf32>
    %cst_6 = arith.constant 0.00999999977 : f32
    %8 = vector.broadcast %cst_6 : f32 to vector<8x128xf32>
    %9 = arith.mulf %8, %5 : vector<8x128xf32>
    %10 = arith.select %7, %5, %9 : vector<8x128xi1>, vector<8x128xf32>
    %c0_7 = arith.constant 0 : index
    %c0_8 = arith.constant 0 : index
    %11 = vector.load %arg3[%c0_7, %c0_8] : memref<1x128xf32, #tpu.memory_space<vmem>>, vector<1x128xf32>
    %c0_9 = arith.constant 0 : index
    %c0_10 = arith.constant 0 : index
    %12 = vector.load %arg4[%c0_9, %c0_10] : memref<1x128xf32, #tpu.memory_space<vmem>>, vector<1x128xf32>
    %cst_11 = arith.constant dense<0.000000e+00> : vector<128xf32>
    %13 = vector.multi_reduction <add>, %10, %cst_11 [0] : vector<8x128xf32> to vector<128xf32>
    %14 = vector.shape_cast %13 : vector<128xf32> to vector<1x128xf32>
    %cst_12 = arith.constant 8.000000e+00 : f32
    %15 = vector.broadcast %cst_12 : f32 to vector<1x128xf32>
    %16 = arith.divf %14, %15 : vector<1x128xf32>
    %17 = arith.mulf %10, %10 : vector<8x128xf32>
    %cst_13 = arith.constant dense<0.000000e+00> : vector<128xf32>
    %18 = vector.multi_reduction <add>, %17, %cst_13 [0] : vector<8x128xf32> to vector<128xf32>
    %19 = vector.shape_cast %18 : vector<128xf32> to vector<1x128xf32>
    %cst_14 = arith.constant 8.000000e+00 : f32
    %20 = vector.broadcast %cst_14 : f32 to vector<1x128xf32>
    %21 = arith.divf %19, %20 : vector<1x128xf32>
    %22 = arith.mulf %16, %16 : vector<1x128xf32>
    %23 = arith.subf %21, %22 : vector<1x128xf32>
    %cst_15 = arith.constant 9.99999974E-6 : f32
    %24 = vector.broadcast %cst_15 : f32 to vector<1x128xf32>
    %25 = arith.addf %23, %24 : vector<1x128xf32>
    %26 = math.rsqrt %25 : vector<1x128xf32>
    %27 = arith.mulf %26, %11 : vector<1x128xf32>
    %28 = arith.mulf %16, %27 : vector<1x128xf32>
    %29 = arith.subf %12, %28 : vector<1x128xf32>
    %30 = vector.broadcast %27 : vector<1x128xf32> to vector<8x128xf32>
    %31 = arith.mulf %10, %30 : vector<8x128xf32>
    %32 = vector.broadcast %29 : vector<1x128xf32> to vector<8x128xf32>
    %33 = arith.addf %31, %32 : vector<8x128xf32>
    %c0_16 = arith.constant 0 : index
    %c0_17 = arith.constant 0 : index
    %34 = vector.load %arg5[%c0_16, %c0_17] : memref<128x128xf32, #tpu.memory_space<vmem>>, vector<128x128xf32>
    %cst_18 = arith.constant dense<0.000000e+00> : vector<8x128xf32>
    %35 = tpu.matmul %33, %34, %cst_18 {dimension_numbers = #tpu.dot_dimension_numbers<[1], [0], [0], [1], [0, 0, 1, 1], [], []>} : vector<8x128xf32>, vector<128x128xf32>, vector<8x128xf32> -> vector<8x128xf32>
    %c0_19 = arith.constant 0 : index
    %c0_20 = arith.constant 0 : index
    %36 = vector.load %arg6[%c0_19, %c0_20] : memref<1x128xf32, #tpu.memory_space<vmem>>, vector<1x128xf32>
    %37 = vector.broadcast %36 : vector<1x128xf32> to vector<8x128xf32>
    %38 = arith.addf %35, %37 : vector<8x128xf32>
    %cst_21 = arith.constant 0.000000e+00 : f32
    %39 = vector.broadcast %cst_21 : f32 to vector<8x128xf32>
    %40 = arith.cmpf oge, %38, %39 : vector<8x128xf32>
    %cst_22 = arith.constant 0.00999999977 : f32
    %41 = vector.broadcast %cst_22 : f32 to vector<8x128xf32>
    %42 = arith.mulf %41, %38 : vector<8x128xf32>
    %43 = arith.select %40, %38, %42 : vector<8x128xi1>, vector<8x128xf32>
    %c0_23 = arith.constant 0 : index
    %c0_24 = arith.constant 0 : index
    %44 = vector.load %arg7[%c0_23, %c0_24] : memref<1x128xf32, #tpu.memory_space<vmem>>, vector<1x128xf32>
    %c0_25 = arith.constant 0 : index
    %c0_26 = arith.constant 0 : index
    %45 = vector.load %arg8[%c0_25, %c0_26] : memref<1x128xf32, #tpu.memory_space<vmem>>, vector<1x128xf32>
    %cst_27 = arith.constant dense<0.000000e+00> : vector<128xf32>
    %46 = vector.multi_reduction <add>, %43, %cst_27 [0] : vector<8x128xf32> to vector<128xf32>
    %47 = vector.shape_cast %46 : vector<128xf32> to vector<1x128xf32>
    %cst_28 = arith.constant 8.000000e+00 : f32
    %48 = vector.broadcast %cst_28 : f32 to vector<1x128xf32>
    %49 = arith.divf %47, %48 : vector<1x128xf32>
    %50 = arith.mulf %43, %43 : vector<8x128xf32>
    %cst_29 = arith.constant dense<0.000000e+00> : vector<128xf32>
    %51 = vector.multi_reduction <add>, %50, %cst_29 [0] : vector<8x128xf32> to vector<128xf32>
    %52 = vector.shape_cast %51 : vector<128xf32> to vector<1x128xf32>
    %cst_30 = arith.constant 8.000000e+00 : f32
    %53 = vector.broadcast %cst_30 : f32 to vector<1x128xf32>
    %54 = arith.divf %52, %53 : vector<1x128xf32>
    %55 = arith.mulf %49, %49 : vector<1x128xf32>
    %56 = arith.subf %54, %55 : vector<1x128xf32>
    %cst_31 = arith.constant 9.99999974E-6 : f32
    %57 = vector.broadcast %cst_31 : f32 to vector<1x128xf32>
    %58 = arith.addf %56, %57 : vector<1x128xf32>
    %59 = math.rsqrt %58 : vector<1x128xf32>
    %60 = arith.mulf %59, %44 : vector<1x128xf32>
    %61 = arith.mulf %49, %60 : vector<1x128xf32>
    %62 = arith.subf %45, %61 : vector<1x128xf32>
    %63 = vector.broadcast %60 : vector<1x128xf32> to vector<8x128xf32>
    %64 = arith.mulf %43, %63 : vector<8x128xf32>
    %65 = vector.broadcast %62 : vector<1x128xf32> to vector<8x128xf32>
    %66 = arith.addf %64, %65 : vector<8x128xf32>
    %c0_32 = arith.constant 0 : index
    %c0_33 = arith.constant 0 : index
    %67 = vector.load %arg9[%c0_32, %c0_33] : memref<128x128xf32, #tpu.memory_space<vmem>>, vector<128x128xf32>
    %cst_34 = arith.constant dense<0.000000e+00> : vector<8x128xf32>
    %68 = tpu.matmul %66, %67, %cst_34 {dimension_numbers = #tpu.dot_dimension_numbers<[1], [0], [0], [1], [0, 0, 1, 1], [], []>} : vector<8x128xf32>, vector<128x128xf32>, vector<8x128xf32> -> vector<8x128xf32>
    %c0_35 = arith.constant 0 : index
    %c0_36 = arith.constant 0 : index
    %69 = vector.load %arg10[%c0_35, %c0_36] : memref<1x128xf32, #tpu.memory_space<vmem>>, vector<1x128xf32>
    %70 = vector.broadcast %69 : vector<1x128xf32> to vector<8x128xf32>
    %71 = arith.addf %68, %70 : vector<8x128xf32>
    %cst_37 = arith.constant 0.000000e+00 : f32
    %72 = vector.broadcast %cst_37 : f32 to vector<8x128xf32>
    %73 = arith.cmpf oge, %71, %72 : vector<8x128xf32>
    %cst_38 = arith.constant 0.00999999977 : f32
    %74 = vector.broadcast %cst_38 : f32 to vector<8x128xf32>
    %75 = arith.mulf %74, %71 : vector<8x128xf32>
    %76 = arith.select %73, %71, %75 : vector<8x128xi1>, vector<8x128xf32>
    %c0_39 = arith.constant 0 : index
    %c0_40 = arith.constant 0 : index
    %77 = vector.load %arg11[%c0_39, %c0_40] : memref<1x128xf32, #tpu.memory_space<vmem>>, vector<1x128xf32>
    %c0_41 = arith.constant 0 : index
    %c0_42 = arith.constant 0 : index
    %78 = vector.load %arg12[%c0_41, %c0_42] : memref<1x128xf32, #tpu.memory_space<vmem>>, vector<1x128xf32>
    %cst_43 = arith.constant dense<0.000000e+00> : vector<128xf32>
    %79 = vector.multi_reduction <add>, %76, %cst_43 [0] : vector<8x128xf32> to vector<128xf32>
    %80 = vector.shape_cast %79 : vector<128xf32> to vector<1x128xf32>
    %cst_44 = arith.constant 8.000000e+00 : f32
    %81 = vector.broadcast %cst_44 : f32 to vector<1x128xf32>
    %82 = arith.divf %80, %81 : vector<1x128xf32>
    %83 = arith.mulf %76, %76 : vector<8x128xf32>
    %cst_45 = arith.constant dense<0.000000e+00> : vector<128xf32>
    %84 = vector.multi_reduction <add>, %83, %cst_45 [0] : vector<8x128xf32> to vector<128xf32>
    %85 = vector.shape_cast %84 : vector<128xf32> to vector<1x128xf32>
    %cst_46 = arith.constant 8.000000e+00 : f32
    %86 = vector.broadcast %cst_46 : f32 to vector<1x128xf32>
    %87 = arith.divf %85, %86 : vector<1x128xf32>
    %88 = arith.mulf %82, %82 : vector<1x128xf32>
    %89 = arith.subf %87, %88 : vector<1x128xf32>
    %cst_47 = arith.constant 9.99999974E-6 : f32
    %90 = vector.broadcast %cst_47 : f32 to vector<1x128xf32>
    %91 = arith.addf %89, %90 : vector<1x128xf32>
    %92 = math.rsqrt %91 : vector<1x128xf32>
    %93 = arith.mulf %92, %77 : vector<1x128xf32>
    %94 = arith.mulf %82, %93 : vector<1x128xf32>
    %95 = arith.subf %78, %94 : vector<1x128xf32>
    %96 = vector.broadcast %93 : vector<1x128xf32> to vector<8x128xf32>
    %97 = arith.mulf %76, %96 : vector<8x128xf32>
    %98 = vector.broadcast %95 : vector<1x128xf32> to vector<8x128xf32>
    %99 = arith.addf %97, %98 : vector<8x128xf32>
    %c0_48 = arith.constant 0 : index
    %c0_49 = arith.constant 0 : index
    %100 = vector.load %arg13[%c0_48, %c0_49] : memref<128x128xf32, #tpu.memory_space<vmem>>, vector<128x128xf32>
    %cst_50 = arith.constant dense<0.000000e+00> : vector<8x128xf32>
    %101 = tpu.matmul %99, %100, %cst_50 {dimension_numbers = #tpu.dot_dimension_numbers<[1], [0], [0], [1], [0, 0, 1, 1], [], []>} : vector<8x128xf32>, vector<128x128xf32>, vector<8x128xf32> -> vector<8x128xf32>
    %c0_51 = arith.constant 0 : index
    %c0_52 = arith.constant 0 : index
    %102 = vector.load %arg14[%c0_51, %c0_52] : memref<1x128xf32, #tpu.memory_space<vmem>>, vector<1x128xf32>
    %103 = vector.broadcast %102 : vector<1x128xf32> to vector<8x128xf32>
    %104 = arith.addf %101, %103 : vector<8x128xf32>
    %c0_53 = arith.constant 0 : index
    %c0_54 = arith.constant 0 : index
    %105 = vector.load %arg15[%c0_53, %c0_54] : memref<8x128xf32, #tpu.memory_space<vmem>>, vector<8x128xf32>
    tpu.vector_store %arg15[%c0_53, %c0_54], %104 {strides = array<i32>} : memref<8x128xf32, #tpu.memory_space<vmem>>, vector<8x128xf32>,
    return
  }
}

</mosaic_0001>

<bundles_post_ra>
// kernel: tpu_custom_call.1
= control target key start
LH: loop header
LB: loop body
LE: loop exit
PB: predicated region body
PF: predicated region fallthrough
CT: control target
= control target key end

     0   :  { %s1344_s0 = inlined_call_operand.hbm [shape: f32[8,128], index: 0, kind: input, shape index: {}]   ;;  %s1345_s1 = inlined_call_operand.hbm [shape: f32[128,128], index: 1, kind: input, shape index: {}]   ;;  %s1346_s2 = inlined_call_operand.vmem [shape: f32[1,128], index: 2, kind: input, shape index: {}]   ;;  %s1347_s3 = inlined_call_operand.vmem [shape: f32[1,128], index: 3, kind: input, shape index: {}]   ;;  %s1348_s4 = inlined_call_operand.vmem [shape: f32[1,128], index: 4, kind: input, shape index: {}]   ;;  %s1349_s5 = inlined_call_operand.hbm [shape: f32[128,128], index: 5, kind: input, shape index: {}]   ;;  %s1350_s6 = inlined_call_operand.vmem [shape: f32[1,128], index: 6, kind: input, shape index: {}]   ;;  %s1351_s7 = inlined_call_operand.vmem [shape: f32[1,128], index: 7, kind: input, shape index: {}]   ;;  %s1352_s8 = inlined_call_operand.vmem [shape: f32[1,128], index: 8, kind: input, shape index: {}]   ;;  %s1353_s9 = inlined_call_operand.hbm [shape: f32[128,128], index: 9, kind: input, shape index: {}]   ;;  %s1354_s10 = inlined_call_operand.vmem [shape: f32[1,128], index: 10, kind: input, shape index: {}]   ;;  %s1355_s11 = inlined_call_operand.vmem [shape: f32[1,128], index: 11, kind: input, shape index: {}]   ;;  %s1356_s12 = inlined_call_operand.vmem [shape: f32[1,128], index: 12, kind: input, shape index: {}]   ;;  %s1357_s13 = inlined_call_operand.hbm [shape: f32[128,128], index: 13, kind: input, shape index: {}]   ;;  %s1358_s14 = inlined_call_operand.vmem [shape: f32[1,128], index: 14, kind: input, shape index: {}]   ;;  %s1359_s15 = inlined_call_operand.hbm [shape: f32[8,128], index: 15, kind: output, shape index: {}]  }
   0x1   :  { %1361 = sst [smem:[#allocation16_spill]] %s1359_s15 }
   0x2   :  { %20 = vsyncpa [#allocation3], 0 }
   0x3   :  { %21 = vsyncpa [#allocation6], 0 }
   0x4   :  { %22 = vsyncpa [#allocation9], 0 }
   0x5   :  { %23 = vsyncpa [#allocation4], 0  ;;  %s1091_s18 = smov [#allocation5]   ;;  %s951_s22 = scalar_lea.hbm %s1345_s1, 2048 }
   0x6   :  { %s39_s19 = sshll.u32 %s1091_s18, 4  ;;  %p952_p0 = scmp.ne.s32.totalorder %s1345_s1, %s951_s22  ;;  %s40_s19 = int_to_ptr.vmem [resolvable:$true] %s39_s19 }
   0x7   :  { %p955_p1 = scmp.lt.u32.totalorder %s951_s22, %s1345_s1 }
   0x9   :  { %p957_p2 = pnand %p955_p1, %p952_p0 }
   0xb   :  { %960 = shalt.err (!%p957_p2)
}
   0xc   :  { %s961_s27 = scalar_lea.vmem %s40_s19, 2048  ;;  %p966_p4 = scmp.lt.s32.totalorder %s40_s19, %s40_s19 }
   0xd   :  { %p962_p3 = scmp.ne.s32.totalorder %s40_s19, %s961_s27  ;;  %p967_p5 = scmp.lt.s32.totalorder %s961_s27, %s961_s27 }
   0xf   :  { %p968_p6 = por %p967_p5, %p966_p4 }
  0x11   :  { %p969_p7 = pnand %p968_p6, %p962_p3 }
  0x13   :  { %972 = shalt.err (!%p969_p7)
}
  0x14   :  { %s1092_s28 = smov 128   ;;  %s1093_s29 = smov 8  }
  0x15   :  { %45 = dma.hbm_to_vmem [thread:$0]  %s1345_s1, 2048, %s40_s19, [#allocation6], %s1092_s28, %s1092_s28, %s1093_s29  }
  0x16   :  { %s1094_s17 = smov [#allocation8]   ;;  %s1095_s20 = smov [#allocation2]  }
  0x17   :  { %s75_s18 = sshll.u32 %s1094_s17, 4  ;;  %s30_s21 = sshll.u32 %s1095_s20, 4  ;;  %s76_s18 = int_to_ptr.vmem [resolvable:$true] %s75_s18  ;;  %s31_s21 = int_to_ptr.vmem [resolvable:$true] %s30_s21 }
  0x18   :  { %s973_s24 = scalar_lea.hbm %s1353_s9, 2048 }
  0x19   :  { %p974_p8 = scmp.ne.s32.totalorder %s1353_s9, %s973_s24  ;;  %p977_p9 = scmp.lt.u32.totalorder %s973_s24, %s1353_s9 }
  0x1b   :  { %p979_p10 = pnand %p977_p9, %p974_p8 }
  0x1d   :  { %982 = shalt.err (!%p979_p10)
}
  0x1e   :  { %s983_s1 = scalar_lea.vmem %s76_s18, 2048  ;;  %p988_p12 = scmp.lt.s32.totalorder %s76_s18, %s76_s18 }
  0x1f   :  { %p984_p11 = scmp.ne.s32.totalorder %s76_s18, %s983_s1  ;;  %p989_p13 = scmp.lt.s32.totalorder %s983_s1, %s983_s1 }
  0x21   :  { %p990_p0 = por %p989_p13, %p988_p12 }
  0x23   :  { %p991_p1 = pnand %p990_p0, %p984_p11 }
  0x25   :  { %994 = shalt.err (!%p991_p1)
}
  0x26   :  { %81 = dma.hbm_to_vmem [thread:$0]  %s1353_s9, 2048, %s76_s18, [#allocation9], %s1092_s28, %s1092_s28, %s1093_s29  }
  0x27   :  { %s995_s17 = scalar_lea.hbm %s1344_s0, 128 }
  0x28   :  { %p996_p2 = scmp.ne.s32.totalorder %s1344_s0, %s995_s17  ;;  %p999_p3 = scmp.lt.u32.totalorder %s995_s17, %s1344_s0 }
  0x2a   :  { %p1001_p4 = pnand %p999_p3, %p996_p2 }
  0x2c   :  { %1004 = shalt.err (!%p1001_p4)
}
  0x2d   :  { %s1005_s25 = scalar_lea.vmem %s31_s21, 128  ;;  %p1010_p6 = scmp.lt.s32.totalorder %s31_s21, %s31_s21 }
  0x2e   :  { %p1006_p5 = scmp.ne.s32.totalorder %s31_s21, %s1005_s25  ;;  %p1011_p7 = scmp.lt.s32.totalorder %s1005_s25, %s1005_s25 }
  0x30   :  { %p1012_p8 = por %p1011_p7, %p1010_p6 }
  0x32   :  { %p1013_p9 = pnand %p1012_p8, %p1006_p5 }
  0x34   :  { %1016 = shalt.err (!%p1013_p9)
}
  0x35   :  { %33 = dma.hbm_to_vmem [thread:$0]  %s1344_s0, 128, %s31_s21, [#allocation3]  }
  0x36   :  { %s1096_s26 = smov [#allocation7]   ;;  %s1097_s1 = smov [#allocation10]  }
  0x37   :  { %s57_s27 = sshll.u32 %s1096_s26, 4  ;;  %s93_s19 = sshll.u32 %s1097_s1, 4  ;;  %s58_s27 = int_to_ptr.vmem [resolvable:$true] %s57_s27  ;;  %s94_s19 = int_to_ptr.vmem [resolvable:$true] %s93_s19 }
  0x38   :  { %s1017_s15 = scalar_lea.hbm %s1349_s5, 2048 }
  0x39   :  { %p1018_p10 = scmp.ne.s32.totalorder %s1349_s5, %s1017_s15  ;;  %p1021_p11 = scmp.lt.u32.totalorder %s1017_s15, %s1349_s5 }
  0x3b   :  { %p1023_p12 = pnand %p1021_p11, %p1018_p10 }
  0x3d   :  { %1026 = shalt.err (!%p1023_p12)
}
  0x3e   :  { %s1027_s0 = scalar_lea.vmem %s58_s27, 2048  ;;  %p1032_p0 = scmp.lt.s32.totalorder %s58_s27, %s58_s27 }
  0x3f   :  { %p1028_p13 = scmp.ne.s32.totalorder %s58_s27, %s1027_s0  ;;  %p1033_p1 = scmp.lt.s32.totalorder %s1027_s0, %s1027_s0 }
  0x41   :  { %p1034_p2 = por %p1033_p1, %p1032_p0 }
  0x43   :  { %p1035_p3 = pnand %p1034_p2, %p1028_p13 }
  0x45   :  { %1038 = shalt.err (!%p1035_p3)
}
  0x46   :  { %63 = dma.hbm_to_vmem [thread:$0]  %s1349_s5, 2048, %s58_s27, [#allocation6], %s1092_s28, %s1092_s28, %s1093_s29  }
  0x47   :  { %s1039_s18 = scalar_lea.hbm %s1357_s13, 2048 }
  0x48   :  { %p1040_p4 = scmp.ne.s32.totalorder %s1357_s13, %s1039_s18  ;;  %p1043_p5 = scmp.lt.u32.totalorder %s1039_s18, %s1357_s13 }
  0x4a   :  { %p1045_p6 = pnand %p1043_p5, %p1040_p4 }
  0x4c   :  { %1048 = shalt.err (!%p1045_p6)
}
  0x4d   :  { %s1049_s15 = scalar_lea.vmem %s94_s19, 2048  ;;  %p1054_p8 = scmp.lt.s32.totalorder %s94_s19, %s94_s19 }
  0x4e   :  { %p1050_p7 = scmp.ne.s32.totalorder %s94_s19, %s1049_s15  ;;  %p1055_p9 = scmp.lt.s32.totalorder %s1049_s15, %s1049_s15 }
  0x50   :  { %p1056_p10 = por %p1055_p9, %p1054_p8 }
  0x52   :  { %p1057_p11 = pnand %p1056_p10, %p1050_p7 }
  0x54   :  { %1060 = shalt.err (!%p1057_p11)
}
  0x55   :  { %99 = dma.hbm_to_vmem [thread:$0]  %s1357_s13, 2048, %s94_s19, [#allocation9], %s1092_s28, %s1092_s28, %s1093_s29  }
  0x56   :  { %1083 = dma.done.wait [#allocation3], 128  }
  0x57   :  { %1084 = vsyncadd [#allocation3], 4294967168 }
  0x58   :  { %1085 = dma.done.wait [#allocation6], 4096  }
  0x59   :  { %1086 = vsyncadd [#allocation6], 4294963200 }
  0x5a   :  { %1087 = dma.done.wait [#allocation9], 4096  }
  0x5b   :  { %1088 = vsyncadd [#allocation9], 4294963200  ;;  %v1098_v0 = vmov 0.0|0.0   ;;  %vm1099_vm0 = vmmov 0   ;;  %v1100_v1 = vmov 0.0   ;;  %v118_v2 = vld [vmem:[#allocation5] sm:$0xff] }
  0x5c   :  { %838 = vmatprep.subr.bf16.mxu0 %v1098_v0  ;;  %730 = vmatprep.mubr.msk.f32.mxu0 %vm1099_vm0, %v1100_v1  ;;  %v119_v3 = vld [vmem:[#allocation5 + $0x8] sm:$0xff]  ;;  %v120_v4 = vld [vmem:[#allocation5 + $0x10] sm:$0xff]  ;;  %v121_v6 = vld [vmem:[#allocation5 + $0x18] sm:$0xff] }
  0x5d   :  { %862 = vmatprep.subr.bf16.mxu1 %v1098_v0  ;;  %765 = vmatprep.mubr.msk.f32.mxu1 %vm1099_vm0, %v1100_v1  ;;  %v839_v5 = vpack.c.bf16 %v119_v3, %v118_v2  ;;  %v842_v7 = vpack.c.bf16 %v121_v6, %v120_v4  ;;  %v122_v8 = vld [vmem:[#allocation5 + $0x20] sm:$0xff]  ;;  %v123_v9 = vld [vmem:[#allocation5 + $0x28] sm:$0xff]  ;;  %v124_v11 = vld [vmem:[#allocation5 + $0x30] sm:$0xff] }
  0x5e   :  { %v845_v10 = vpack.c.bf16 %v123_v9, %v122_v8  ;;  %v125_v12 = vld [vmem:[#allocation5 + $0x38] sm:$0xff]  ;;  %v126_v14 = vld [vmem:[#allocation5 + $0x40] sm:$0xff]  ;;  %v127_v15 = vld [vmem:[#allocation5 + $0x48] sm:$0xff] }
  0x5f   :  { %840 = vmatpush3.bf16.msra.mxu0 %v839_v5  ;;  %v848_v13 = vpack.c.bf16 %v125_v12, %v124_v11  ;;  %v851_v16 = vpack.c.bf16 %v127_v15, %v126_v14  ;;  %v128_v17 = vld [vmem:[#allocation5 + $0x50] sm:$0xff]  ;;  %v129_v18 = vld [vmem:[#allocation5 + $0x58] sm:$0xff]  ;;  %v130_v20 = vld [vmem:[#allocation5 + $0x60] sm:$0xff] }
  0x60   :  { %841 = vmatprep.subr.bf16.mxu0 %v1098_v0  ;;  %v854_v19 = vpack.c.bf16 %v129_v18, %v128_v17  ;;  %v131_v21 = vld [vmem:[#allocation5 + $0x68] sm:$0xff]  ;;  %v132_v23 = vld [vmem:[#allocation5 + $0x70] sm:$0xff]  ;;  %v133_v24 = vld [vmem:[#allocation5 + $0x78] sm:$0xff] }
  0x61   :  { %v857_v22 = vpack.c.bf16 %v131_v21, %v130_v20  ;;  %v860_v25 = vpack.c.bf16 %v133_v24, %v132_v23  ;;  %v117_v26 = vld [vmem:[#allocation2] sm:$0xff]  ;;  %v251_v27 = vld [vmem:[#allocation7] sm:$0xff]  ;;  %v252_v28 = vld [vmem:[#allocation7 + $0x8] sm:$0xff] }
  0x62   :  { %v863_v29 = vpack.c.bf16 %v252_v28, %v251_v27  ;;  %v253_v30 = vld [vmem:[#allocation7 + $0x10] sm:$0xff]  ;;  %v254_v31 = vld [vmem:[#allocation7 + $0x18] sm:$0xff]  ;;  %v255_v33 = vld [vmem:[#allocation7 + $0x20] sm:$0xff] }
  0x63   :  { %843 = vmatpush3.bf16.msra.mxu0 %v842_v7  ;;  %v866_v32 = vpack.c.bf16 %v254_v31, %v253_v30  ;;  %v256_v34 = vld [vmem:[#allocation7 + $0x28] sm:$0xff]  ;;  %v257_v36 = vld [vmem:[#allocation7 + $0x30] sm:$0xff]  ;;  %v258_v37 = vld [vmem:[#allocation7 + $0x38] sm:$0xff] }
  0x64   :  { %844 = vmatprep.subr.bf16.mxu0 %v1098_v0  ;;  %864 = vmatpush3.bf16.msra.mxu1 %v863_v29  ;;  %v869_v35 = vpack.c.bf16 %v256_v34, %v255_v33  ;;  %v872_v38 = vpack.c.bf16 %v258_v37, %v257_v36  ;;  %v259_v39 = vld [vmem:[#allocation7 + $0x40] sm:$0xff]  ;;  %v260_v40 = vld [vmem:[#allocation7 + $0x48] sm:$0xff]  ;;  %v261_v42 = vld [vmem:[#allocation7 + $0x50] sm:$0xff] }
  0x65   :  { %865 = vmatprep.subr.bf16.mxu1 %v1098_v0  ;;  %v875_v41 = vpack.c.bf16 %v260_v40, %v259_v39  ;;  %v262_v43 = vld [vmem:[#allocation7 + $0x58] sm:$0xff]  ;;  %v263_v45 = vld [vmem:[#allocation7 + $0x60] sm:$0xff]  ;;  %v264_v46 = vld [vmem:[#allocation7 + $0x68] sm:$0xff] }
  0x66   :  { %v878_v44 = vpack.c.bf16 %v262_v43, %v261_v42  ;;  %v881_v47 = vpack.c.bf16 %v264_v46, %v263_v45  ;;  %v265_v48 = vld [vmem:[#allocation7 + $0x70] sm:$0xff]  ;;  %v266_v49 = vld [vmem:[#allocation7 + $0x78] sm:$0xff]  ;;  %v384_v27 = vld [vmem:[#allocation8 + $0x8] sm:$0xff] }
  0x67   :  { %846 = vmatpush3.bf16.msra.mxu0 %v845_v10  ;;  %v884_v50 = vpack.c.bf16 %v266_v49, %v265_v48  ;;  %v626_v51 = vld [vmem:[%s1346_s2] ss:$0 sm:$0xff]  ;;  %v385_v29 = vld [vmem:[#allocation8 + $0x10] sm:$0xff]  ;;  %v388_v33 = vld [vmem:[#allocation8 + $0x28] sm:$0xff] }
  0x68   :  { %847 = vmatprep.subr.bf16.mxu0 %v1098_v0  ;;  %867 = vmatpush3.bf16.msra.mxu1 %v866_v32  ;;  %v214_v15 = vld [vmem:[%s1347_s3] sm:$0x1]  ;;  %v387_v32 = vld [vmem:[#allocation8 + $0x20] sm:$0xff]  ;;  %v393_v40 = vld [vmem:[#allocation8 + $0x50] sm:$0xff] }
  0x69   :  { %868 = vmatprep.subr.bf16.mxu1 %v1098_v0  ;;  %v386_v30 = vld [vmem:[#allocation8 + $0x18] sm:$0xff]  ;;  %v893_v34 = vpack.c.bf16 %v388_v33, %v387_v32  ;;  %v391_v37 = vld [vmem:[#allocation8 + $0x40] sm:$0xff]  ;;  %v397_v46 = vld [vmem:[#allocation8 + $0x70] sm:$0xff] }
  0x6a   :  { %v890_v31 = vpack.c.bf16 %v386_v30, %v385_v29  ;;  %v395_v43 = vld [vmem:[#allocation8 + $0x60] sm:$0xff]  ;;  %v627_v49 = vld [vmem:[%s1350_s6] ss:$0 sm:$0xff]  ;;  %v520_v29 = vld [vmem:[#allocation10 + $0x28] sm:$0xff] }
  0x6b   :  { %849 = vmatpush3.bf16.msra.mxu0 %v848_v13  ;;  %v239_v13 = vlaneseq  ;;  %v522_v32 = vld [vmem:[#allocation10 + $0x38] sm:$0xff] }
  0x6c   :  { %850 = vmatprep.subr.bf16.mxu0 %v1098_v0  ;;  %870 = vmatpush3.bf16.msra.mxu1 %v869_v35  ;;  %v389_v35 = vld [vmem:[#allocation8 + $0x30] sm:$0xff] }
  0x6d   :  { %871 = vmatprep.subr.bf16.mxu1 %v1098_v0  ;;  %v240_v14 = vshrl.u32 %v239_v13, 7 }
  0x6f   :  { %852 = vmatpush3.bf16.msra.mxu0 %v851_v16  ;;  %v1284_v16 = vsub.s32 0, %v240_v14  ;;  %v348_v14 = vld [vmem:[%s1352_s8] sm:$0x1] }
  0x70   :  { %853 = vmatprep.subr.bf16.mxu0 %v1098_v0  ;;  %873 = vmatpush3.bf16.msra.mxu1 %v872_v38  ;;  %v392_v38 = vld [vmem:[#allocation8 + $0x48] sm:$0xff] }
  0x71   :  { %874 = vmatprep.subr.bf16.mxu1 %v1098_v0  ;;  %v899_v39 = vpack.c.bf16 %v392_v38, %v391_v37  ;;  %v526_v37 = vld [vmem:[#allocation10 + $0x58] sm:$0xff] }
  0x73   :  { %855 = vmatpush3.bf16.msra.mxu0 %v854_v19  ;;  %v215_v19 = vld [vmem:[%s1348_s4] sm:$0x1] }
  0x74   :  { %856 = vmatprep.subr.bf16.mxu0 %v1098_v0  ;;  %876 = vmatpush3.bf16.msra.mxu1 %v875_v41  ;;  %v394_v41 = vld [vmem:[#allocation8 + $0x58] sm:$0xff] }
  0x75   :  { %877 = vmatprep.subr.bf16.mxu1 %v1098_v0  ;;  %v902_v42 = vpack.c.bf16 %v394_v41, %v393_v40  ;;  %v528_v40 = vld [vmem:[#allocation10 + $0x68] sm:$0xff] }
  0x77   :  { %858 = vmatpush3.bf16.msra.mxu0 %v857_v22 }
  0x78   :  { %859 = vmatprep.subr.bf16.mxu0 %v1098_v0  ;;  %879 = vmatpush3.bf16.msra.mxu1 %v878_v44  ;;  %v396_v44 = vld [vmem:[#allocation8 + $0x68] sm:$0xff] }
  0x79   :  { %880 = vmatprep.subr.bf16.mxu1 %v1098_v0  ;;  %v905_v45 = vpack.c.bf16 %v396_v44, %v395_v43  ;;  %v530_v43 = vld [vmem:[#allocation10 + $0x78] sm:$0xff] }
  0x7b   :  { %861 = vmatpush3.bf16.msra.mxu0 %v860_v25 }
  0x7c   :  { %886 = vmatprep.subr.bf16.mxu0 %v1098_v0  ;;  %882 = vmatpush3.bf16.msra.mxu1 %v881_v47  ;;  %v398_v47 = vld [vmem:[#allocation8 + $0x78] sm:$0xff] }
  0x7d   :  { %883 = vmatprep.subr.bf16.mxu1 %v1098_v0  ;;  %v908_v48 = vpack.c.bf16 %v398_v47, %v397_v46 }
  0x7e   :  { %731 = vmatmul.mubr.f32.vlgmr.msra.gmra.mrb[0].mxu0 %v117_v26  ;;  %v383_v26 = vld [vmem:[#allocation8] sm:$0xff] }
  0x7f   :  { %800 = vmatprep.mubr.msk.f32.mxu0 %vm1099_vm0, %v1100_v1  ;;  %v887_v28 = vpack.c.bf16 %v384_v27, %v383_v26  ;;  %v518_v26 = vld [vmem:[#allocation10 + $0x18] sm:$0xff] }
  0x80   :  { %885 = vmatpush3.bf16.msra.mxu1 %v884_v50 }
  0x81   :  { %910 = vmatprep.subr.bf16.mxu1 %v1098_v0  ;;  %888 = vmatpush3.bf16.msra.mxu0 %v887_v28  ;;  %v519_v28 = vld [vmem:[#allocation10 + $0x20] sm:$0xff] }
  0x82   :  { %889 = vmatprep.subr.bf16.mxu0 %v1098_v0  ;;  %v917_v30 = vpack.c.bf16 %v520_v29, %v519_v28 }
  0x85   :  { %891 = vmatpush3.bf16.msra.mxu0 %v890_v31  ;;  %v521_v31 = vld [vmem:[#allocation10 + $0x30] sm:$0xff] }
  0x86   :  { %892 = vmatprep.subr.bf16.mxu0 %v1098_v0  ;;  %v920_v33 = vpack.c.bf16 %v522_v32, %v521_v31 }
  0x89   :  { %894 = vmatpush3.bf16.msra.mxu0 %v893_v34  ;;  %v523_v34 = vld [vmem:[#allocation10 + $0x40] sm:$0xff] }
  0x8a   :  { %895 = vmatprep.subr.bf16.mxu0 %v1098_v0 }
 0x151   :  { %v207_v52 = vpop.f32.mrb[0].mxu0 }
 0x152   :  { %v208_v53 = vadd.f32 %v626_v51, %v207_v52  ;;  %v732_v54 = vpop.f32.mrb[1].mxu0 }
 0x154   :  { %vm211_vm1 = vcmp.ge.f32.partialorder %v208_v53, 0.0  ;;  %v212_v55 = vmul.f32 0.01, %v208_v53 }
 0x156   :  { %v213_v56 = vsel %vm211_vm1, %v208_v53, %v212_v55 }
 0x157   :  { %v216_v57 = vrot.slane %v213_v56, 4  ;;  %v224_v58 = vmul.f32 %v213_v56, %v213_v56 }
 0x159   :  { %v217_v59 = vadd.f32 %v216_v57, %v213_v56  ;;  %v225_v60 = vrot.slane %v224_v58, 4 }
 0x15b   :  { %v218_v61 = vrot.slane %v217_v59, 2  ;;  %v226_v62 = vadd.f32 %v225_v60, %v224_v58 }
 0x15d   :  { %v219_v63 = vadd.f32 %v218_v61, %v217_v59  ;;  %v227_v2 = vrot.slane %v226_v62, 2 }
 0x15f   :  { %v220_v3 = vrot.slane %v219_v63, 1  ;;  %v228_v4 = vadd.f32 %v227_v2, %v226_v62 }
 0x161   :  { %v229_v5 = vrot.slane %v228_v4, 1  ;;  %v221_v6 = vadd.f32 %v220_v3, %v219_v63 }
 0x163   :  { %v230_v7 = vadd.f32 %v229_v5, %v228_v4  ;;  %v223_v8 = vmul.f32 0.125, %v221_v6 }
 0x165   :  { %v231_v9 = vmul.f32 0.125, %v230_v7  ;;  %v232_v10 = vmul.f32 %v223_v8, %v223_v8 }
 0x167   :  { %v233_v11 = vsub.f32 %v231_v9, %v232_v10 }
 0x169   :  { %v234_v12 = vadd.f32 1e-05, %v233_v11  ;;  %v347_v11 = vld [vmem:[%s1351_s7] sm:$0x1] }
 0x16b   :  { %945 = vrsqrt.f32 %v234_v12 }
 0x175   :  { %v946_v17 = vpop.eup %945 }
 0x176   :  { %v236_v18 = vmul.f32 %v946_v17, %v214_v15 }
 0x178   :  { %v237_v20 = vmul.f32 %v236_v18, %v223_v8  ;;  %v242_v21 = vrot.slane %v236_v18, %v1284_v16 }
 0x17a   :  { %v238_v22 = vsub.f32 %v215_v19, %v237_v20  ;;  %v243_v23 = vmul.f32 %v242_v21, %v213_v56 }
 0x17c   :  { %v248_v24 = vrot.slane %v238_v22, %v1284_v16  ;;  %v515_v22 = vld [vmem:[#allocation10] sm:$0xff] }
 0x17e   :  { %v250_v25 = vadd.f32 %v248_v24, %v243_v23  ;;  %v516_v23 = vld [vmem:[#allocation10 + $0x8] sm:$0xff] }
 0x17f   :  { %v911_v24 = vpack.c.bf16 %v516_v23, %v515_v22 }
 0x180   :  { %766 = vmatmul.mubr.f32.vlgmr.msra.gmra.mrb[0].mxu1 %v250_v25  ;;  %v517_v25 = vld [vmem:[#allocation10 + $0x10] sm:$0xff] }
 0x181   :  { %835 = vmatprep.mubr.msk.f32.mxu1 %vm1099_vm0, %v1100_v1  ;;  %v390_v1 = vld [vmem:[#allocation8 + $0x38] sm:$0xff]  ;;  %912 = vmatpush3.bf16.msra.mxu1 %v911_v24  ;;  %v914_v27 = vpack.c.bf16 %v518_v26, %v517_v25 }
 0x182   :  { %v896_v36 = vpack.c.bf16 %v390_v1, %v389_v35  ;;  %913 = vmatprep.subr.bf16.mxu1 %v1098_v0  ;;  %v524_v35 = vld [vmem:[#allocation10 + $0x48] sm:$0xff] }
 0x183   :  { %v923_v1 = vpack.c.bf16 %v524_v35, %v523_v34 }
 0x184   :  { %897 = vmatpush3.bf16.msra.mxu0 %v896_v36  ;;  %v525_v36 = vld [vmem:[#allocation10 + $0x50] sm:$0xff] }
 0x185   :  { %898 = vmatprep.subr.bf16.mxu0 %v1098_v0  ;;  %915 = vmatpush3.bf16.msra.mxu1 %v914_v27  ;;  %v926_v38 = vpack.c.bf16 %v526_v37, %v525_v36 }
 0x186   :  { %916 = vmatprep.subr.bf16.mxu1 %v1098_v0 }
 0x188   :  { %900 = vmatpush3.bf16.msra.mxu0 %v899_v39  ;;  %v527_v39 = vld [vmem:[#allocation10 + $0x60] sm:$0xff] }
 0x189   :  { %901 = vmatprep.subr.bf16.mxu0 %v1098_v0  ;;  %918 = vmatpush3.bf16.msra.mxu1 %v917_v30  ;;  %v929_v41 = vpack.c.bf16 %v528_v40, %v527_v39 }
 0x18a   :  { %919 = vmatprep.subr.bf16.mxu1 %v1098_v0 }
 0x18c   :  { %903 = vmatpush3.bf16.msra.mxu0 %v902_v42  ;;  %v529_v42 = vld [vmem:[#allocation10 + $0x70] sm:$0xff] }
 0x18d   :  { %904 = vmatprep.subr.bf16.mxu0 %v1098_v0  ;;  %921 = vmatpush3.bf16.msra.mxu1 %v920_v33  ;;  %v932_v44 = vpack.c.bf16 %v530_v43, %v529_v42 }
 0x18e   :  { %922 = vmatprep.subr.bf16.mxu1 %v1098_v0 }
 0x190   :  { %906 = vmatpush3.bf16.msra.mxu0 %v905_v45  ;;  %v628_v45 = vld [vmem:[%s1354_s10] ss:$0 sm:$0xff] }
 0x191   :  { %907 = vmatprep.subr.bf16.mxu0 %v1098_v0  ;;  %924 = vmatpush3.bf16.msra.mxu1 %v923_v1 }
 0x192   :  { %925 = vmatprep.subr.bf16.mxu1 %v1098_v0 }
 0x194   :  { %909 = vmatpush3.bf16.msra.mxu0 %v908_v48 }
 0x195   :  { %927 = vmatpush3.bf16.msra.mxu1 %v926_v38 }
 0x196   :  { %928 = vmatprep.subr.bf16.mxu1 %v1098_v0 }
 0x199   :  { %930 = vmatpush3.bf16.msra.mxu1 %v929_v41 }
 0x19a   :  { %931 = vmatprep.subr.bf16.mxu1 %v1098_v0 }
 0x19d   :  { %933 = vmatpush3.bf16.msra.mxu1 %v932_v44 }
 0x253   :  { %v340_v50 = vpop.f32.mrb[0].mxu1 }
 0x254   :  { %v341_v51 = vadd.f32 %v627_v49, %v340_v50  ;;  %v767_v52 = vpop.f32.mrb[1].mxu1 }
 0x256   :  { %vm344_vm2 = vcmp.ge.f32.partialorder %v341_v51, 0.0  ;;  %v345_v53 = vmul.f32 0.01, %v341_v51 }
 0x258   :  { %v346_v54 = vsel %vm344_vm2, %v341_v51, %v345_v53 }
 0x259   :  { %v349_v55 = vrot.slane %v346_v54, 4  ;;  %v356_v56 = vmul.f32 %v346_v54, %v346_v54 }
 0x25b   :  { %v350_v57 = vadd.f32 %v349_v55, %v346_v54  ;;  %v357_v58 = vrot.slane %v356_v56, 4 }
 0x25d   :  { %v351_v59 = vrot.slane %v350_v57, 2  ;;  %v358_v60 = vadd.f32 %v357_v58, %v356_v56 }
 0x25f   :  { %v352_v61 = vadd.f32 %v351_v59, %v350_v57  ;;  %v359_v62 = vrot.slane %v358_v60, 2 }
 0x261   :  { %v353_v63 = vrot.slane %v352_v61, 1  ;;  %v360_v2 = vadd.f32 %v359_v62, %v358_v60 }
 0x263   :  { %v354_v3 = vadd.f32 %v353_v63, %v352_v61  ;;  %v361_v4 = vrot.slane %v360_v2, 1 }
 0x265   :  { %v355_v5 = vmul.f32 0.125, %v354_v3  ;;  %v362_v6 = vadd.f32 %v361_v4, %v360_v2 }
 0x267   :  { %v363_v7 = vmul.f32 0.125, %v362_v6  ;;  %v364_v8 = vmul.f32 %v355_v5, %v355_v5  ;;  %v479_v6 = vld [vmem:[%s1355_s11] sm:$0x1]  ;;  %s1101_s11 = smov [#allocation11]  }
 0x268   :  { %s615_s18 = sshll.u32 %s1101_s11, 4  ;;  %s616_s18 = int_to_ptr.vmem [resolvable:$true] %s615_s18 }
 0x269   :  { %v365_v9 = vsub.f32 %v363_v7, %v364_v8  ;;  %p1066_p13 = scmp.lt.s32.totalorder %s616_s18, %s616_s18 }
 0x26b   :  { %v366_v10 = vadd.f32 1e-05, %v365_v9  ;;  %v480_v9 = vld [vmem:[%s1356_s12] sm:$0x1]  ;;  %s1061_s12 = scalar_lea.vmem %s616_s18, 128 }
 0x26c   :  { %p1062_p12 = scmp.ne.s32.totalorder %s616_s18, %s1061_s12  ;;  %p1067_p0 = scmp.lt.s32.totalorder %s1061_s12, %s1061_s12 }
 0x26d   :  { %947 = vrsqrt.f32 %v366_v10 }
 0x26e   :  { %p1068_p1 = por %p1067_p0, %p1066_p13 }
 0x270   :  { %p1069_p2 = pnand %p1068_p1, %p1062_p12 }
 0x277   :  { %v948_v12 = vpop.eup %947 }
 0x278   :  { %v368_v13 = vmul.f32 %v948_v12, %v347_v11 }
 0x27a   :  { %v374_v15 = vrot.slane %v368_v13, %v1284_v16  ;;  %v369_v17 = vmul.f32 %v368_v13, %v355_v5 }
 0x27c   :  { %v370_v18 = vsub.f32 %v348_v14, %v369_v17  ;;  %v375_v19 = vmul.f32 %v374_v15, %v346_v54  ;;  %v629_v17 = vld [vmem:[%s1358_s14] ss:$0 sm:$0xff] }
 0x27e   :  { %v380_v20 = vrot.slane %v370_v18, %v1284_v16 }
 0x280   :  { %v382_v21 = vadd.f32 %v380_v20, %v375_v19 }
 0x282   :  { %801 = vmatmul.mubr.f32.vlgmr.msra.gmra.mrb[2].mxu0 %v382_v21 }
 0x355   :  { %v472_v46 = vpop.f32.mrb[2].mxu0 }
 0x356   :  { %v473_v47 = vadd.f32 %v628_v45, %v472_v46  ;;  %v802_v48 = vpop.f32.mrb[3].mxu0 }
 0x358   :  { %vm476_vm3 = vcmp.ge.f32.partialorder %v473_v47, 0.0  ;;  %v477_v49 = vmul.f32 0.01, %v473_v47 }
 0x35a   :  { %v478_v50 = vsel %vm476_vm3, %v473_v47, %v477_v49 }
 0x35b   :  { %v481_v51 = vrot.slane %v478_v50, 4  ;;  %v488_v52 = vmul.f32 %v478_v50, %v478_v50 }
 0x35d   :  { %v482_v53 = vadd.f32 %v481_v51, %v478_v50  ;;  %v489_v54 = vrot.slane %v488_v52, 4 }
 0x35f   :  { %v483_v55 = vrot.slane %v482_v53, 2  ;;  %v490_v0 = vadd.f32 %v489_v54, %v488_v52 }
 0x361   :  { %v484_v56 = vadd.f32 %v483_v55, %v482_v53  ;;  %v491_v57 = vrot.slane %v490_v0, 2 }
 0x363   :  { %v485_v58 = vrot.slane %v484_v56, 1  ;;  %v492_v59 = vadd.f32 %v491_v57, %v490_v0 }
 0x365   :  { %v486_v60 = vadd.f32 %v485_v58, %v484_v56  ;;  %v493_v61 = vrot.slane %v492_v59, 1 }
 0x367   :  { %v487_v62 = vmul.f32 0.125, %v486_v60  ;;  %v494_v63 = vadd.f32 %v493_v61, %v492_v59 }
 0x369   :  { %v495_v2 = vmul.f32 0.125, %v494_v63  ;;  %v496_v3 = vmul.f32 %v487_v62, %v487_v62 }
 0x36b   :  { %v497_v4 = vsub.f32 %v495_v2, %v496_v3 }
 0x36d   :  { %v498_v5 = vadd.f32 1e-05, %v497_v4 }
 0x36f   :  { %949 = vrsqrt.f32 %v498_v5 }
 0x379   :  { %v950_v7 = vpop.eup %949 }
 0x37a   :  { %v500_v8 = vmul.f32 %v950_v7, %v479_v6 }
 0x37c   :  { %v506_v10 = vrot.slane %v500_v8, %v1284_v16  ;;  %v501_v11 = vmul.f32 %v500_v8, %v487_v62 }
 0x37e   :  { %v502_v12 = vsub.f32 %v480_v9, %v501_v11  ;;  %v507_v13 = vmul.f32 %v506_v10, %v478_v50 }
 0x380   :  { %v512_v14 = vrot.slane %v502_v12, %v1284_v16 }
 0x382   :  { %v514_v15 = vadd.f32 %v512_v14, %v507_v13 }
 0x384   :  { %836 = vmatmul.mubr.f32.vlgmr.msra.gmra.mrb[2].mxu1 %v514_v15 }
 0x457   :  { %v604_v18 = vpop.f32.mrb[2].mxu1 }
 0x458   :  { %v605_v19 = vadd.f32 %v629_v17, %v604_v18  ;;  %v837_v20 = vpop.f32.mrb[3].mxu1 }
 0x45a   :  { %608 = vst [vmem:[#allocation11] sm:$0xff] %v605_v19 }
 0x45b   :  { %1072 = shalt.err (!%p1069_p2)
}
 0x45c   :  { %s1362_s30 = sld [smem:[#allocation16_spill]] }
 0x462   :  { %s1073_s16 = scalar_lea.hbm %s1362_s30, 128 }
 0x463   :  { %p1074_p3 = scmp.ne.s32.totalorder %s1362_s30, %s1073_s16  ;;  %p1077_p4 = scmp.lt.u32.totalorder %s1073_s16, %s1362_s30 }
 0x465   :  { %p1079_p5 = pnand %p1077_p4, %p1074_p3 }
 0x467   :  { %1082 = shalt.err (!%p1079_p5)
}
 0x468   :  { %618 = dma.vmem_to_hbm [thread:$0]  %s616_s18, 128, %s1362_s30, [#allocation4]  }
 0x469   :  { %1089 = dma.done.wait [#allocation4], 128  }
 0x46a   :  { %1090 = vsyncadd [#allocation4], 4294967168 }
 0x46b   :  { %622 = vsyncpa [#allocation3], 1 }
 0x46c   :  { %623 = vsyncpa [#allocation6], 1 }
 0x46d   :  { %624 = vsyncpa [#allocation9], 1 }
 0x46e   :  { %625 = vsyncpa [#allocation4], 1 }

</bundles_post_ra>
